<compile_context>
chip_gen: v7x
topology: tpu7x:2x2x1
jax: 0.10.0
libtpu: 0.0.40
codegen_flags: <defaults>
</compile_context>

<pallas_src>
import jax
import jax.numpy as jnp
from jax.experimental import pallas as pl
from jax.experimental.pallas import tpu as pltpu


def _softplus(x):
    # Matches torch.log(1 + torch.exp(rho)) exactly.
    return jnp.log1p(jnp.exp(x))


def _round_up(n, m):
    return ((n + m - 1) // m) * m


def _pad_to(a, shape):
    return jnp.pad(a, [(0, t - s) for s, t in zip(a.shape, shape)])


# ---------------------------------------------------------------------------
# Fused kernel: one-time weight sampling into VMEM scratch + batch-tiled MLP.
# ---------------------------------------------------------------------------
def mlp_bbb_fused_kernel(x_ref, w1_ref, b1_ref, w2_ref, b2_ref, o_ref,
                         w1_s, b1_s, w2_s, b2_s):
    # Sample reparameterized weights ONCE; scratch persists across batch tiles
    # (grid axis is sequential / "arbitrary").
    @pl.when(pl.program_id(0) == 0)
    def _():
        w1_s[...] = w1_ref[0] + _softplus(w1_ref[1]) * w1_ref[2]
        b1_s[...] = b1_ref[0] + _softplus(b1_ref[1]) * b1_ref[2]
        w2_s[...] = w2_ref[0] + _softplus(w2_ref[1]) * w2_ref[2]
        b2_s[...] = b2_ref[0] + _softplus(b2_ref[1]) * b2_ref[2]

    x = x_ref[...]                                                   # (TB, I)
    h = jnp.dot(x, w1_s[...], preferred_element_type=jnp.float32) + b1_s[...]
    h = jax.nn.sigmoid(h)                                            # (TB, Hp)
    y = jnp.dot(h, w2_s[...], preferred_element_type=jnp.float32) + b2_s[...]
    o_ref[...] = jax.nn.sigmoid(y)                                   # (TB, Op)


def mlp_bbb_forward(x, params, tb=256):
    """x: (B, I) float32. params: module-layout mu/rho/eps arrays. Returns (B, O)."""
    (w1_mu, w1_rho, w1_eps, b1_mu, b1_rho, b1_eps,
     w2_mu, w2_rho, w2_eps, b2_mu, b2_rho, b2_eps) = params

    B, I = x.shape
    H = w1_mu.shape[0]
    O = w2_mu.shape[0]
    Hp = _round_up(H, 128)                 # lane-dense hidden dim
    Op = _round_up(O, 128)                 # lane-dense output dim (unmasked vst)
    TB = min(_round_up(tb, 8), _round_up(B, 8))
    Bp = _round_up(B, TB)

    f32 = jnp.float32

    # ---- wrapper-side layout plumbing: transpose to (in, out), zero-pad ----
    def prep_w1(a):   # (H, I) -> (I, Hp)
        return _pad_to(a.T.astype(f32), (I, Hp))

    def prep_b1(a):   # (H,) -> (1, Hp)
        return _pad_to(a.reshape(1, -1).astype(f32), (1, Hp))

    def prep_w2(a):   # (O, H) -> (Hp, Op)
        return _pad_to(a.T.astype(f32), (Hp, Op))

    def prep_b2(a):   # (O,) -> (1, Op)
        return _pad_to(a.reshape(1, -1).astype(f32), (1, Op))

    # Stack mu / rho / eps along a leading axis: 4 resident operands, not 12.
    w1_all = jnp.stack([prep_w1(w1_mu), prep_w1(w1_rho), prep_w1(w1_eps)])   # (3, I, Hp)
    b1_all = jnp.stack([prep_b1(b1_mu), prep_b1(b1_rho), prep_b1(b1_eps)])   # (3, 1, Hp)
    w2_all = jnp.stack([prep_w2(w2_mu), prep_w2(w2_rho), prep_w2(w2_eps)])   # (3, Hp, Op)
    b2_all = jnp.stack([prep_b2(b2_mu), prep_b2(b2_rho), prep_b2(b2_eps)])   # (3, 1, Op)

    x_pad = _pad_to(x.astype(f32), (Bp, I))

    def resident(shape):
        # Constant index map -> DMA'd once, stays VMEM-resident across tiles.
        return pl.BlockSpec(shape, lambda i: (0,) * len(shape))

    y_pad = pl.pallas_call(
        mlp_bbb_fused_kernel,
        out_shape=jax.ShapeDtypeStruct((Bp, Op), f32),
        grid=(Bp // TB,),
        in_specs=[
            pl.BlockSpec((TB, I), lambda i: (i, 0)),     # x: tiled over batch
            resident((3, I, Hp)),                        # w1 mu/rho/eps
            resident((3, 1, Hp)),                        # b1 mu/rho/eps
            resident((3, Hp, Op)),                       # w2 mu/rho/eps
            resident((3, 1, Op)),                        # b2 mu/rho/eps
        ],
        out_specs=pl.BlockSpec((TB, Op), lambda i: (i, 0)),
        scratch_shapes=[
            pltpu.VMEM((I, Hp), f32),                    # sampled w1 (resident)
            pltpu.VMEM((1, Hp), f32),                    # sampled b1
            pltpu.VMEM((Hp, Op), f32),                   # sampled w2
            pltpu.VMEM((1, Op), f32),                    # sampled b2
        ],
        compiler_params=pltpu.CompilerParams(
            # Sequential: scratch sampled at tile 0 is reused by all tiles.
            dimension_semantics=("arbitrary",)),
    )(x_pad, w1_all, b1_all, w2_all, b2_all)

    return y_pad[:B, :O]


# ---------------------------------------------------------------------------
# Test harness
# ---------------------------------------------------------------------------
def make_params(key, input_units, hidden_units, output_units):
    # Module __init__ uses zeros for mu/rho; we use small random values so the
    # correctness check exercises every term.  Epsilon ~ Normal(0.5, 1) is the
    # fixed per-forward weight sample.
    ks = jax.random.split(key, 8)
    f32 = jnp.float32
    w1_mu = 0.1 * jax.random.normal(ks[0], (hidden_units, input_units), f32)
    w1_rho = 0.1 * jax.random.normal(ks[1], (hidden_units, input_units), f32)
    w1_eps = 0.5 + jax.random.normal(ks[2], (hidden_units, input_units), f32)
    b1_mu = 0.1 * jax.random.normal(ks[3], (hidden_units,), f32)
    b1_rho = 0.1 * jax.random.normal(ks[4], (hidden_units,), f32)
    b1_eps = 0.5 + jax.random.normal(ks[5], (hidden_units,), f32)

    w2_mu = 0.1 * jax.random.normal(ks[6], (output_units, hidden_units), f32)
    w2_rho = 0.1 * jax.random.normal(ks[7], (output_units, hidden_units), f32)
    w2_eps = 0.5 + jax.random.normal(ks[0], (output_units, hidden_units), f32)
    b2_mu = 0.1 * jax.random.normal(ks[1], (output_units,), f32)
    b2_rho = 0.1 * jax.random.normal(ks[2], (output_units,), f32)
    b2_eps = 0.5 + jax.random.normal(ks[3], (output_units,), f32)

    return (w1_mu, w1_rho, w1_eps, b1_mu, b1_rho, b1_eps,
            w2_mu, w2_rho, w2_eps, b2_mu, b2_rho, b2_eps)


def reference_forward(x, params):
    (w1_mu, w1_rho, w1_eps, b1_mu, b1_rho, b1_eps,
     w2_mu, w2_rho, w2_eps, b2_mu, b2_rho, b2_eps) = params
    w1 = w1_mu + jnp.log1p(jnp.exp(w1_rho)) * w1_eps
    b1 = b1_mu + jnp.log1p(jnp.exp(b1_rho)) * b1_eps
    h = jax.nn.sigmoid(x @ w1.T + b1)
    w2 = w2_mu + jnp.log1p(jnp.exp(w2_rho)) * w2_eps
    b2 = b2_mu + jnp.log1p(jnp.exp(b2_rho)) * b2_eps
    return jax.nn.sigmoid(h @ w2.T + b2)


if __name__ == "__main__":
    # Shapes consistent with the module: output_units=6 (sample_elbo), modest
    # input/hidden sizes, small batch.
    batch, input_units, hidden_units, output_units = 32, 4, 32, 6

    key = jax.random.PRNGKey(0)
    kx, kp = jax.random.split(key)
    x = jax.random.normal(kx, (batch, input_units), jnp.float32)
    params = make_params(kp, input_units, hidden_units, output_units)
    y_ref = reference_forward(x, params)

    # Config 1: single batch tile (default tb) -> one grid step.
    y1 = jax.block_until_ready(mlp_bbb_forward(x, params))
    assert y1.shape == (batch, output_units)
    assert jnp.allclose(y1, y_ref, atol=1e-5, rtol=1e-5), (
        float(jnp.max(jnp.abs(y1 - y_ref))))

    # Config 2: small tile (tb=8) -> 4 grid steps; exercises the pl.when
    # one-time sampling + scratch persistence across batch tiles.
    y2 = jax.block_until_ready(mlp_bbb_forward(x, params, tb=8))
    assert jnp.allclose(y2, y_ref, atol=1e-5, rtol=1e-5), (
        float(jnp.max(jnp.abs(y2 - y_ref))))

    print("KERNEL_OK")
</pallas_src>

<mosaic_0001>
module attributes {stable_mosaic.version = 11 : i64} {
  func.func @mlp_bbb_fused_kernel(%arg0: i32, %arg1: memref<32x4xf32, #tpu.memory_space<vmem>>, %arg2: memref<3x4x128xf32, #tpu.memory_space<vmem>>, %arg3: memref<3x1x128xf32, #tpu.memory_space<vmem>>, %arg4: memref<3x128x128xf32, #tpu.memory_space<vmem>>, %arg5: memref<3x1x128xf32, #tpu.memory_space<vmem>>, %arg6: memref<32x128xf32, #tpu.memory_space<vmem>>, %arg7: memref<4x128xf32, #tpu.memory_space<vmem>>, %arg8: memref<1x128xf32, #tpu.memory_space<vmem>>, %arg9: memref<128x128xf32, #tpu.memory_space<vmem>>, %arg10: memref<1x128xf32, #tpu.memory_space<vmem>>) attributes {dimension_semantics = [#tpu.dimension_semantics<arbitrary>], iteration_bounds = array<i64: 1>, scalar_prefetch = 0 : i64, scratch_operands = 4 : i64, tpu.core_type = #tpu.core_type<tc>, window_params = [{transform_indices = @transform_0, window_bounds = array<i64: 32, 4>}, {pipeline_mode = #tpu.pipeline_mode<synchronous>, transform_indices = @transform_1, window_bounds = array<i64: 3, 4, 128>}, {pipeline_mode = #tpu.pipeline_mode<synchronous>, transform_indices = @transform_2, window_bounds = array<i64: 3, 1, 128>}, {pipeline_mode = #tpu.pipeline_mode<synchronous>, transform_indices = @transform_3, window_bounds = array<i64: 3, 128, 128>}, {pipeline_mode = #tpu.pipeline_mode<synchronous>, transform_indices = @transform_4, window_bounds = array<i64: 3, 1, 128>}, {transform_indices = @transform_5, window_bounds = array<i64: 32, 128>}]} {
    %c0_i32 = arith.constant 0 : i32
    %0 = arith.cmpi eq, %arg0, %c0_i32 : i32
    %1 = arith.extui %0 : i1 to i32
    %c0_i32_0 = arith.constant 0 : i32
    %2 = arith.cmpi ne, %1, %c0_i32_0 : i32
    scf.if %2 {
      %c0_15 = arith.constant 0 : index
      %c0_16 = arith.constant 0 : index
      %c0_17 = arith.constant 0 : index
      %25 = vector.load %arg2[%c0_15, %c0_16, %c0_17] : memref<3x4x128xf32, #tpu.memory_space<vmem>>, vector<1x4x128xf32>
      %26 = vector.shape_cast %25 : vector<1x4x128xf32> to vector<4x128xf32>
      %c1 = arith.constant 1 : index
      %c0_18 = arith.constant 0 : index
      %c0_19 = arith.constant 0 : index
      %27 = vector.load %arg2[%c1, %c0_18, %c0_19] : memref<3x4x128xf32, #tpu.memory_space<vmem>>, vector<1x4x128xf32>
      %28 = vector.shape_cast %27 : vector<1x4x128xf32> to vector<4x128xf32>
      %29 = math.exp %28 : vector<4x128xf32>
      %30 = math.log1p %29 : vector<4x128xf32>
      %c2 = arith.constant 2 : index
      %c0_20 = arith.constant 0 : index
      %c0_21 = arith.constant 0 : index
      %31 = vector.load %arg2[%c2, %c0_20, %c0_21] : memref<3x4x128xf32, #tpu.memory_space<vmem>>, vector<1x4x128xf32>
      %32 = vector.shape_cast %31 : vector<1x4x128xf32> to vector<4x128xf32>
      %33 = arith.mulf %30, %32 : vector<4x128xf32>
      %34 = arith.addf %26, %33 : vector<4x128xf32>
      %c0_22 = arith.constant 0 : index
      %c0_23 = arith.constant 0 : index
      %35 = vector.load %arg7[%c0_22, %c0_23] : memref<4x128xf32, #tpu.memory_space<vmem>>, vector<4x128xf32>
      tpu.vector_store %arg7[%c0_22, %c0_23], %34 {strides = array<i32>} : memref<4x128xf32, #tpu.memory_space<vmem>>, vector<4x128xf32>,
      %c0_24 = arith.constant 0 : index
      %c0_25 = arith.constant 0 : index
      %c0_26 = arith.constant 0 : index
      %36 = vector.load %arg3[%c0_24, %c0_25, %c0_26] : memref<3x1x128xf32, #tpu.memory_space<vmem>>, vector<1x1x128xf32>
      %37 = vector.shape_cast %36 : vector<1x1x128xf32> to vector<1x128xf32>
      %c1_27 = arith.constant 1 : index
      %c0_28 = arith.constant 0 : index
      %c0_29 = arith.constant 0 : index
      %38 = vector.load %arg3[%c1_27, %c0_28, %c0_29] : memref<3x1x128xf32, #tpu.memory_space<vmem>>, vector<1x1x128xf32>
      %39 = vector.shape_cast %38 : vector<1x1x128xf32> to vector<1x128xf32>
      %40 = math.exp %39 : vector<1x128xf32>
      %41 = math.log1p %40 : vector<1x128xf32>
      %c2_30 = arith.constant 2 : index
      %c0_31 = arith.constant 0 : index
      %c0_32 = arith.constant 0 : index
      %42 = vector.load %arg3[%c2_30, %c0_31, %c0_32] : memref<3x1x128xf32, #tpu.memory_space<vmem>>, vector<1x1x128xf32>
      %43 = vector.shape_cast %42 : vector<1x1x128xf32> to vector<1x128xf32>
      %44 = arith.mulf %41, %43 : vector<1x128xf32>
      %45 = arith.addf %37, %44 : vector<1x128xf32>
      %c0_33 = arith.constant 0 : index
      %c0_34 = arith.constant 0 : index
      %46 = vector.load %arg8[%c0_33, %c0_34] : memref<1x128xf32, #tpu.memory_space<vmem>>, vector<1x128xf32>
      tpu.vector_store %arg8[%c0_33, %c0_34], %45 {strides = array<i32>} : memref<1x128xf32, #tpu.memory_space<vmem>>, vector<1x128xf32>,
      %c0_35 = arith.constant 0 : index
      %c0_36 = arith.constant 0 : index
      %c0_37 = arith.constant 0 : index
      %47 = vector.load %arg4[%c0_35, %c0_36, %c0_37] : memref<3x128x128xf32, #tpu.memory_space<vmem>>, vector<1x128x128xf32>
      %48 = vector.shape_cast %47 : vector<1x128x128xf32> to vector<128x128xf32>
      %c1_38 = arith.constant 1 : index
      %c0_39 = arith.constant 0 : index
      %c0_40 = arith.constant 0 : index
      %49 = vector.load %arg4[%c1_38, %c0_39, %c0_40] : memref<3x128x128xf32, #tpu.memory_space<vmem>>, vector<1x128x128xf32>
      %50 = vector.shape_cast %49 : vector<1x128x128xf32> to vector<128x128xf32>
      %51 = math.exp %50 : vector<128x128xf32>
      %52 = math.log1p %51 : vector<128x128xf32>
      %c2_41 = arith.constant 2 : index
      %c0_42 = arith.constant 0 : index
      %c0_43 = arith.constant 0 : index
      %53 = vector.load %arg4[%c2_41, %c0_42, %c0_43] : memref<3x128x128xf32, #tpu.memory_space<vmem>>, vector<1x128x128xf32>
      %54 = vector.shape_cast %53 : vector<1x128x128xf32> to vector<128x128xf32>
      %55 = arith.mulf %52, %54 : vector<128x128xf32>
      %56 = arith.addf %48, %55 : vector<128x128xf32>
      %c0_44 = arith.constant 0 : index
      %c0_45 = arith.constant 0 : index
      %57 = vector.load %arg9[%c0_44, %c0_45] : memref<128x128xf32, #tpu.memory_space<vmem>>, vector<128x128xf32>
      tpu.vector_store %arg9[%c0_44, %c0_45], %56 {strides = array<i32>} : memref<128x128xf32, #tpu.memory_space<vmem>>, vector<128x128xf32>,
      %c0_46 = arith.constant 0 : index
      %c0_47 = arith.constant 0 : index
      %c0_48 = arith.constant 0 : index
      %58 = vector.load %arg5[%c0_46, %c0_47, %c0_48] : memref<3x1x128xf32, #tpu.memory_space<vmem>>, vector<1x1x128xf32>
      %59 = vector.shape_cast %58 : vector<1x1x128xf32> to vector<1x128xf32>
      %c1_49 = arith.constant 1 : index
      %c0_50 = arith.constant 0 : index
      %c0_51 = arith.constant 0 : index
      %60 = vector.load %arg5[%c1_49, %c0_50, %c0_51] : memref<3x1x128xf32, #tpu.memory_space<vmem>>, vector<1x1x128xf32>
      %61 = vector.shape_cast %60 : vector<1x1x128xf32> to vector<1x128xf32>
      %62 = math.exp %61 : vector<1x128xf32>
      %63 = math.log1p %62 : vector<1x128xf32>
      %c2_52 = arith.constant 2 : index
      %c0_53 = arith.constant 0 : index
      %c0_54 = arith.constant 0 : index
      %64 = vector.load %arg5[%c2_52, %c0_53, %c0_54] : memref<3x1x128xf32, #tpu.memory_space<vmem>>, vector<1x1x128xf32>
      %65 = vector.shape_cast %64 : vector<1x1x128xf32> to vector<1x128xf32>
      %66 = arith.mulf %63, %65 : vector<1x128xf32>
      %67 = arith.addf %59, %66 : vector<1x128xf32>
      %c0_55 = arith.constant 0 : index
      %c0_56 = arith.constant 0 : index
      %68 = vector.load %arg10[%c0_55, %c0_56] : memref<1x128xf32, #tpu.memory_space<vmem>>, vector<1x128xf32>
      tpu.vector_store %arg10[%c0_55, %c0_56], %67 {strides = array<i32>} : memref<1x128xf32, #tpu.memory_space<vmem>>, vector<1x128xf32>,
    } else {
    }
    %c0 = arith.constant 0 : index
    %c0_1 = arith.constant 0 : index
    %3 = vector.load %arg1[%c0, %c0_1] : memref<32x4xf32, #tpu.memory_space<vmem>>, vector<32x4xf32>
    %c0_2 = arith.constant 0 : index
    %c0_3 = arith.constant 0 : index
    %4 = vector.load %arg7[%c0_2, %c0_3] : memref<4x128xf32, #tpu.memory_space<vmem>>, vector<4x128xf32>
    %cst = arith.constant dense<0.000000e+00> : vector<32x128xf32>
    %5 = tpu.matmul %3, %4, %cst {dimension_numbers = #tpu.dot_dimension_numbers<[1], [0], [0], [1], [0, 0, 1, 1], [], []>} : vector<32x4xf32>, vector<4x128xf32>, vector<32x128xf32> -> vector<32x128xf32>
    %c0_4 = arith.constant 0 : index
    %c0_5 = arith.constant 0 : index
    %6 = vector.load %arg8[%c0_4, %c0_5] : memref<1x128xf32, #tpu.memory_space<vmem>>, vector<1x128xf32>
    %7 = vector.broadcast %6 : vector<1x128xf32> to vector<32x128xf32>
    %8 = arith.addf %5, %7 : vector<32x128xf32>
    %9 = arith.negf %8 : vector<32x128xf32>
    %10 = math.exp %9 : vector<32x128xf32>
    %cst_6 = arith.constant 1.000000e+00 : f32
    %11 = vector.broadcast %cst_6 : f32 to vector<32x128xf32>
    %12 = arith.addf %11, %10 : vector<32x128xf32>
    %13 = arith.divf %11, %12 : vector<32x128xf32>
    %c0_7 = arith.constant 0 : index
    %c0_8 = arith.constant 0 : index
    %14 = vector.load %arg9[%c0_7, %c0_8] : memref<128x128xf32, #tpu.memory_space<vmem>>, vector<128x128xf32>
    %cst_9 = arith.constant dense<0.000000e+00> : vector<32x128xf32>
    %15 = tpu.matmul %13, %14, %cst_9 {dimension_numbers = #tpu.dot_dimension_numbers<[1], [0], [0], [1], [0, 0, 1, 1], [], []>} : vector<32x128xf32>, vector<128x128xf32>, vector<32x128xf32> -> vector<32x128xf32>
    %c0_10 = arith.constant 0 : index
    %c0_11 = arith.constant 0 : index
    %16 = vector.load %arg10[%c0_10, %c0_11] : memref<1x128xf32, #tpu.memory_space<vmem>>, vector<1x128xf32>
    %17 = vector.broadcast %16 : vector<1x128xf32> to vector<32x128xf32>
    %18 = arith.addf %15, %17 : vector<32x128xf32>
    %19 = arith.negf %18 : vector<32x128xf32>
    %20 = math.exp %19 : vector<32x128xf32>
    %cst_12 = arith.constant 1.000000e+00 : f32
    %21 = vector.broadcast %cst_12 : f32 to vector<32x128xf32>
    %22 = arith.addf %21, %20 : vector<32x128xf32>
    %23 = arith.divf %21, %22 : vector<32x128xf32>
    %c0_13 = arith.constant 0 : index
    %c0_14 = arith.constant 0 : index
    %24 = vector.load %arg6[%c0_13, %c0_14] : memref<32x128xf32, #tpu.memory_space<vmem>>, vector<32x128xf32>
    tpu.vector_store %arg6[%c0_13, %c0_14], %23 {strides = array<i32>} : memref<32x128xf32, #tpu.memory_space<vmem>>, vector<32x128xf32>,
    return
  }
  func.func @transform_0(%arg0: i32) -> (i32, i32) {
    %c0_i32 = arith.constant 0 : i32
    %c0_i32_0 = arith.constant 0 : i32
    return %arg0, %c0_i32 : i32, i32
  }
  func.func @transform_1(%arg0: i32) -> (i32, i32, i32) {
    %c0_i32 = arith.constant 0 : i32
    %c0_i32_0 = arith.constant 0 : i32
    %c0_i32_1 = arith.constant 0 : i32
    %c0_i32_2 = arith.constant 0 : i32
    return %c0_i32, %c0_i32_0, %c0_i32_1 : i32, i32, i32
  }
  func.func @transform_2(%arg0: i32) -> (i32, i32, i32) {
    %c0_i32 = arith.constant 0 : i32
    %c0_i32_0 = arith.constant 0 : i32
    %c0_i32_1 = arith.constant 0 : i32
    %c0_i32_2 = arith.constant 0 : i32
    return %c0_i32, %c0_i32_0, %c0_i32_1 : i32, i32, i32
  }
  func.func @transform_3(%arg0: i32) -> (i32, i32, i32) {
    %c0_i32 = arith.constant 0 : i32
    %c0_i32_0 = arith.constant 0 : i32
    %c0_i32_1 = arith.constant 0 : i32
    %c0_i32_2 = arith.constant 0 : i32
    return %c0_i32, %c0_i32_0, %c0_i32_1 : i32, i32, i32
  }
  func.func @transform_4(%arg0: i32) -> (i32, i32, i32) {
    %c0_i32 = arith.constant 0 : i32
    %c0_i32_0 = arith.constant 0 : i32
    %c0_i32_1 = arith.constant 0 : i32
    %c0_i32_2 = arith.constant 0 : i32
    return %c0_i32, %c0_i32_0, %c0_i32_1 : i32, i32, i32
  }
  func.func @transform_5(%arg0: i32) -> (i32, i32) {
    %c0_i32 = arith.constant 0 : i32
    %c0_i32_0 = arith.constant 0 : i32
    return %arg0, %c0_i32 : i32, i32
  }
}

</mosaic_0001>

<bundles_post_ra>
// kernel: tpu_custom_call.1
= control target key start
LH: loop header
LB: loop body
LE: loop exit
PB: predicated region body
PF: predicated region fallthrough
CT: control target
= control target key end

     0   :  { %10 = vsyncpa [#allocation7], 0  ;;  %s1194_s0 = inlined_call_operand.vmem [shape: f32[32,4], index: 0, kind: input, shape index: {}]   ;;  %s1195_s1 = inlined_call_operand.vmem [shape: f32[3,4,128], index: 1, kind: input, shape index: {}]   ;;  %s1196_s2 = inlined_call_operand.vmem [shape: f32[3,1,128], index: 2, kind: input, shape index: {}]   ;;  %s1197_s3 = inlined_call_operand.hbm [shape: f32[3,128,128], index: 3, kind: input, shape index: {}]   ;;  %s1198_s4 = inlined_call_operand.vmem [shape: f32[3,1,128], index: 4, kind: input, shape index: {}]   ;;  %s1199_s5 = inlined_call_operand.hbm [shape: f32[32,128], index: 5, kind: output, shape index: {}]  }
   0x1   :  { %11 = vsyncpa [#allocation8], 0  ;;  %s961_s18 = smov [#allocation6]   ;;  %s913_s22 = scalar_lea.hbm %s1197_s3, 6144 }
   0x2   :  { %s23_s19 = sshll.u32 %s961_s18, 4  ;;  %p914_p0 = scmp.ne.s32.totalorder %s1197_s3, %s913_s22  ;;  %s24_s19 = int_to_ptr.vmem [resolvable:$true] %s23_s19 }
   0x3   :  { %p917_p1 = scmp.lt.u32.totalorder %s913_s22, %s1197_s3 }
   0x5   :  { %p919_p2 = pnand %p917_p1, %p914_p0 }
   0x7   :  { %922 = shalt.err (!%p919_p2)
}
   0x8   :  { %s923_s27 = scalar_lea.vmem %s24_s19, 6144  ;;  %p928_p4 = scmp.lt.s32.totalorder %s24_s19, %s24_s19 }
   0x9   :  { %p924_p3 = scmp.ne.s32.totalorder %s24_s19, %s923_s27  ;;  %p929_p5 = scmp.lt.s32.totalorder %s923_s27, %s923_s27 }
   0xb   :  { %p930_p6 = por %p929_p5, %p928_p4 }
   0xd   :  { %p931_p7 = pnand %p930_p6, %p924_p3 }
   0xf   :  { %934 = shalt.err (!%p931_p7)
}
  0x10   :  { %s962_s28 = smov 128   ;;  %s963_s29 = smov 8  }
  0x11   :  { %29 = dma.hbm_to_vmem [thread:$0]  %s1197_s3, 6144, %s24_s19, [#allocation7], %s962_s28, %s962_s28, %s963_s29  }
  0x12   :  { %957 = dma.done.wait [#allocation7], 6144  }
  0x13   :  { %958 = vsyncadd [#allocation7], 4294961152  ;;  %vm382_vm0 = vcmask 31744   ;;  %v661_v0 = vld [vmem:[%s1195_s1 + $0x4] sm:$0xf]  ;;  %v95_v4 = vld [vmem:[#allocation6 + $0x88] sm:$0xff] }
  0x14   :  { %v42_v1 = vmul.f32 1.442695, %v661_v0  ;;  %v370_v2 = vld [vmem:[%s1194_s0] sm:$0xff]  ;;  %v112_v6 = vmul.f32 1.442695, %v95_v4  ;;  %v288_v47 = vld [vmem:[#allocation6 + $0x108] sm:$0xff] }
  0x15   :  { %709 = vmatprep.mubr.msk.f32.mxu0 %vm382_vm0, %v370_v2  ;;  %v94_v3 = vld [vmem:[#allocation6 + $0x80] sm:$0xff]  ;;  %v663_v7 = vld [vmem:[%s1196_s2 + $0x1] sm:$0x1]  ;;  %v664_v52 = vld [vmem:[%s1196_s2 + $0x2] sm:$0x1]  ;;  %vm395_vm5 = vcmask 1043456  }
  0x16   :  { %805 = vpow2.f32 %v42_v1  ;;  %v110_v5 = vmul.f32 1.442695, %v94_v3  ;;  %v61_v8 = vmul.f32 1.442695, %v663_v7  ;;  %v662_v31 = vld [vmem:[%s1195_s1 + $0x8] sm:$0xf] }
  0x17   :  { %v39_v35 = vld [vmem:[%s1195_s1] sm:$0xf]  ;;  %v287_v43 = vld [vmem:[#allocation6 + $0x100] sm:$0xff]  ;;  %v78_v53 = vld [vmem:[#allocation6 + $0x8] sm:$0xff] }
  0x18   :  { %807 = vpow2.f32 %v110_v5  ;;  %v77_v49 = vld [vmem:[#allocation6] sm:$0xff]  ;;  %v58_v57 = vld [vmem:[%s1196_s2] sm:$0x1]  ;;  %v372_v2 = vld [vmem:[%s1194_s0 + $0x10] sm:$0xff] }
  0x19   :  { %809 = vpow2.f32 %v112_v6  ;;  %v371_v1 = vld [vmem:[%s1194_s0 + $0x8] sm:$0xff]  ;;  %v373_v3 = vld [vmem:[%s1194_s0 + $0x18] sm:$0xff] }
  0x1a   :  { %811 = vpow2.f32 %v61_v8  ;;  %v96_v4 = vld [vmem:[#allocation6 + $0x90] sm:$0xff]  ;;  %v97_v5 = vld [vmem:[#allocation6 + $0x98] sm:$0xff]  ;;  %v98_v8 = vld [vmem:[#allocation6 + $0xa0] sm:$0xff] }
  0x1b   :  { %v114_v6 = vmul.f32 1.442695, %v96_v4  ;;  %v116_v7 = vmul.f32 1.442695, %v97_v5 }
  0x20   :  { %v806_v9 = vpop.eup %805 }
  0x21   :  { %v44_v10 = vadd.f32 1.0, %v806_v9  ;;  %v47_v13 = vmul.f32 -0.5, %v806_v9  ;;  %v50_v21 = vand.u32 2147483647, %v806_v9 }
  0x22   :  { %v808_v11 = vpop.eup %807 }
  0x23   :  { %813 = vlog2.f32 %v44_v10  ;;  %v810_v12 = vpop.eup %809  ;;  %v142_v14 = vadd.f32 1.0, %v808_v11  ;;  %v145_v18 = vmul.f32 -0.5, %v808_v11  ;;  %v48_v19 = vadd.f32 1.0, %v47_v13  ;;  %v101_v13 = vld [vmem:[#allocation6 + $0xb8] sm:$0xff] }
  0x24   :  { %v812_v15 = vpop.eup %811  ;;  %v151_v16 = vadd.f32 1.0, %v810_v12  ;;  %v154_v20 = vmul.f32 -0.5, %v810_v12  ;;  %v148_v25 = vand.u32 2147483647, %v808_v11  ;;  %vm51_vm1 = vcmp.lt.f32.partialorder %v50_v21, 0.0004427343 }
  0x25   :  { %815 = vlog2.f32 %v142_v14  ;;  %v63_v17 = vadd.f32 1.0, %v812_v15  ;;  %v66_v22 = vmul.f32 -0.5, %v812_v15  ;;  %v146_v23 = vadd.f32 1.0, %v145_v18 }
  0x26   :  { %817 = vlog2.f32 %v151_v16  ;;  %v49_v24 = vmul.f32 %v806_v9, %v48_v19  ;;  %v155_v26 = vadd.f32 1.0, %v154_v20  ;;  %v157_v28 = vand.u32 2147483647, %v810_v12  ;;  %v99_v9 = vld [vmem:[#allocation6 + $0xa8] sm:$0xff]  ;;  %v102_v16 = vld [vmem:[#allocation6 + $0xc0] sm:$0xff] }
  0x27   :  { %819 = vlog2.f32 %v63_v17  ;;  %v67_v29 = vadd.f32 1.0, %v66_v22  ;;  %v69_v32 = vand.u32 2147483647, %v812_v15  ;;  %v147_v33 = vmul.f32 %v808_v11, %v146_v23  ;;  %v103_v17 = vld [vmem:[#allocation6 + $0xc8] sm:$0xff] }
  0x28   :  { %vm1026_vm2 = vcmp.lt.f32.partialorder %v148_v25, 0.0004427343  ;;  %v156_v38 = vmul.f32 %v810_v12, %v155_v26  ;;  %vm1030_vm3 = vcmp.lt.f32.partialorder %v157_v28, 0.0004427343  ;;  %821 = vpow2.f32 %v114_v6  ;;  %v100_v12 = vld [vmem:[#allocation6 + $0xb0] sm:$0xff]  ;;  %v105_v25 = vld [vmem:[#allocation6 + $0xd8] sm:$0xff] }
  0x29   :  { %v68_v44 = vmul.f32 %v812_v15, %v67_v29  ;;  %vm70_vm4 = vcmp.lt.f32.partialorder %v69_v32, 0.0004427343  ;;  %823 = vpow2.f32 %v116_v7  ;;  %v118_v10 = vmul.f32 1.442695, %v98_v8  ;;  %v106_v32 = vld [vmem:[#allocation6 + $0xe0] sm:$0xff]  ;;  %v79_v6 = vld [vmem:[#allocation6 + $0x10] sm:$0xff] }
  0x2a   :  { %v120_v11 = vmul.f32 1.442695, %v99_v9  ;;  %v122_v14 = vmul.f32 1.442695, %v100_v12  ;;  %v124_v15 = vmul.f32 1.442695, %v101_v13 }
  0x2b   :  { %825 = vpow2.f32 %v118_v10  ;;  %v126_v19 = vmul.f32 1.442695, %v102_v16  ;;  %v128_v22 = vmul.f32 1.442695, %v103_v17  ;;  %v80_v7 = vld [vmem:[#allocation6 + $0x18] sm:$0xff] }
  0x2c   :  { %827 = vpow2.f32 %v120_v11 }
  0x2d   :  { %v814_v27 = vpop.eup %813  ;;  %829 = vpow2.f32 %v122_v14 }
  0x2e   :  { %v46_v30 = vmul.f32 0.6931472, %v814_v27  ;;  %831 = vpow2.f32 %v124_v15 }
  0x2f   :  { %v816_v34 = vpop.eup %815  ;;  %833 = vpow2.f32 %v126_v19 }
  0x30   :  { %v52_v36 = vsel %vm51_vm1, %v49_v24, %v46_v30  ;;  %v818_v39 = vpop.eup %817  ;;  %v144_v41 = vmul.f32 0.6931472, %v816_v34  ;;  %v104_v24 = vld [vmem:[#allocation6 + $0xd0] sm:$0xff]  ;;  %v132_v30 = vmul.f32 1.442695, %v105_v25 }
  0x31   :  { %v55_v40 = vmul.f32 %v662_v31, %v52_v36  ;;  %v820_v45 = vpop.eup %819  ;;  %v153_v46 = vmul.f32 0.6931472, %v818_v39  ;;  %v130_v27 = vmul.f32 1.442695, %v104_v24 }
  0x32   :  { %v150_v50 = vsel %vm1026_vm2, %v147_v33, %v144_v41  ;;  %v65_v51 = vmul.f32 0.6931472, %v820_v45  ;;  %v822_v18 = vpop.eup %821  ;;  %v107_v33 = vld [vmem:[#allocation6 + $0xe8] sm:$0xff] }
  0x33   :  { %v56_v48 = vadd.f32 %v55_v40, %v39_v35  ;;  %v159_v54 = vsel %vm1030_vm3, %v156_v38, %v153_v46  ;;  %v303_v55 = vmul.f32 %v287_v43, %v150_v50  ;;  %v824_v20 = vpop.eup %823  ;;  %v160_v21 = vadd.f32 1.0, %v822_v18 }
  0x34   :  { %v304_v56 = vmul.f32 %v288_v47, %v159_v54  ;;  %v71_v58 = vsel %vm70_vm4, %v68_v44, %v65_v51  ;;  %v169_v23 = vadd.f32 1.0, %v824_v20  ;;  %v134_v35 = vmul.f32 1.442695, %v106_v32  ;;  %v82_v32 = vld [vmem:[#allocation6 + $0x28] sm:$0xff] }
  0x35   :  { %57 = vst [vmem:[#allocation2] sm:$0xf] %v56_v48  ;;  %v319_v59 = vadd.f32 %v303_v55, %v77_v49  ;;  %v74_v60 = vmul.f32 %v664_v52, %v71_v58  ;;  %835 = vlog2.f32 %v160_v21  ;;  %v1056_v26 = vpop.eup %825  ;;  %v136_v38 = vmul.f32 1.442695, %v107_v33  ;;  %v292_v21 = vld [vmem:[#allocation6 + $0x128] sm:$0xff] }
  0x36   :  { %v320_v61 = vadd.f32 %v304_v56, %v78_v53  ;;  %837 = vlog2.f32 %v169_v23  ;;  %v1058_v28 = vpop.eup %827  ;;  %v178_v29 = vadd.f32 1.0, %v1056_v26  ;;  %v163_v39 = vmul.f32 -0.5, %v822_v18 }
  0x37   :  { %v75_v62 = vadd.f32 %v74_v60, %v58_v57  ;;  %839 = vpow2.f32 %v128_v22  ;;  %v187_v31 = vadd.f32 1.0, %v1058_v28  ;;  %v1062_v34 = vpop.eup %829  ;;  %v172_v40 = vmul.f32 -0.5, %v824_v20  ;;  %v290_v60 = vld [vmem:[#allocation6 + $0x118] sm:$0xff] }
  0x38   :  { %v753_v63 = vpack.c.bf16 %v320_v61, %v319_v59  ;;  %841 = vpow2.f32 %v130_v27  ;;  %v1064_v36 = vpop.eup %831  ;;  %v196_v37 = vadd.f32 1.0, %v1062_v34  ;;  %v164_v43 = vadd.f32 1.0, %v163_v39  ;;  %v289_v59 = vld [vmem:[#allocation6 + $0x110] sm:$0xff] }
  0x39   :  { %76 = vst [vmem:[#allocation3] sm:$0x1] %v75_v62  ;;  %843 = vlog2.f32 %v178_v29  ;;  %v205_v41 = vadd.f32 1.0, %v1064_v36  ;;  %v1068_v42 = vpop.eup %833  ;;  %v173_v44 = vadd.f32 1.0, %v172_v40  ;;  %v166_v46 = vand.u32 2147483647, %v822_v18 }
  0x3a   :  { %785 = vmatprep.subr.bf16.mxu1 %v753_v63  ;;  %845 = vlog2.f32 %v187_v31  ;;  %v175_v47 = vand.u32 2147483647, %v824_v20  ;;  %v214_v48 = vadd.f32 1.0, %v1068_v42  ;;  %v165_v51 = vmul.f32 %v822_v18, %v164_v43  ;;  %v81_v31 = vld [vmem:[#allocation6 + $0x20] sm:$0xff]  ;;  %v92_v40 = vld [vmem:[#allocation6 + $0x78] sm:$0xff] }
  0x3b   :  { %793 = vmatpush3.bf16.msra.mxu1 %v753_v63  ;;  %847 = vpow2.f32 %v132_v30  ;;  %v174_v52 = vmul.f32 %v824_v20, %v173_v44  ;;  %v181_v53 = vmul.f32 -0.5, %v1056_v26  ;;  %vm167_vm6 = vcmp.lt.f32.partialorder %v166_v46, 0.0004427343  ;;  %v291_v20 = vld [vmem:[#allocation6 + $0x120] sm:$0xff] }
  0x3c   :  { %v374_v0 = vld [vmem:[#allocation2] sm:$0xf]  ;;  %849 = vpow2.f32 %v134_v35  ;;  %vm1074_vm7 = vcmp.lt.f32.partialorder %v175_v47, 0.0004427343  ;;  %v190_v62 = vmul.f32 -0.5, %v1058_v28  ;;  %v199_v22 = vmul.f32 -0.5, %v1062_v34 }
  0x3d   :  { %707 = vmatprep.subr.msk.mxu0 %vm395_vm5, %v374_v0  ;;  %851 = vlog2.f32 %v196_v37  ;;  %v182_v61 = vadd.f32 1.0, %v181_v53  ;;  %v193_v4 = vand.u32 2147483647, %v1058_v28  ;;  %v202_v25 = vand.u32 2147483647, %v1062_v34  ;;  %v108_v47 = vld [vmem:[#allocation6 + $0xf0] sm:$0xff] }
  0x3e   :  { %708 = vmatpush3.msk.msra.mxu0 %vm395_vm5, %v374_v0  ;;  %853 = vlog2.f32 %v205_v41  ;;  %v191_v11 = vadd.f32 1.0, %v190_v62  ;;  %v211_v27 = vand.u32 2147483647, %v1064_v36  ;;  %v200_v35 = vadd.f32 1.0, %v199_v22  ;;  %v84_v62 = vld [vmem:[#allocation6 + $0x38] sm:$0xff] }
  0x3f   :  { %710 = vmatmul.mubr.msk.f32.vlgmr.msra.gmra.mrb[0].mxu0 %vm382_vm0, %v371_v1  ;;  %754 = vmatprep.subr.bf16.mxu0 %v753_v63  ;;  %v836_v45 = vpop.eup %835  ;;  %855 = vpow2.f32 %v136_v38  ;;  %v183_v10 = vmul.f32 %v1056_v26, %v182_v61  ;;  %vm1089_vm9 = vcmp.lt.f32.partialorder %v193_v4, 0.0004427343  ;;  %vm1104_vm10 = vcmp.lt.f32.partialorder %v202_v25, 0.0004427343  ;;  %v109_v22 = vld [vmem:[#allocation6 + $0xf8] sm:$0xff] }
  0x40   :  { %712 = vmatprep.mubr.msk.f32.mxu0 %vm382_vm0, %v372_v2  ;;  %756 = vmatpush3.bf16.msra.mxu0 %v753_v63  ;;  %v838_v49 = vpop.eup %837  ;;  %v162_v50 = vmul.f32 0.6931472, %v836_v45  ;;  %857 = vlog2.f32 %v214_v48  ;;  %v192_v19 = vmul.f32 %v1058_v28, %v191_v11  ;;  %v201_v41 = vmul.f32 %v1062_v34, %v200_v35  ;;  %v293_v45 = vld [vmem:[#allocation6 + $0x130] sm:$0xff] }
  0x41   :  { %v1072_v54 = vpop.eup %839  ;;  %v171_v55 = vmul.f32 0.6931472, %v838_v49  ;;  %v217_v46 = vmul.f32 -0.5, %v1068_v42  ;;  %vm1110_vm11 = vcmp.lt.f32.partialorder %v211_v27, 0.0004427343 }
  0x42   :  { %v1078_v57 = vpop.eup %841  ;;  %v168_v58 = vsel %vm167_vm6, %v165_v51, %v162_v50  ;;  %v223_v63 = vadd.f32 1.0, %v1072_v54  ;;  %v220_v51 = vand.u32 2147483647, %v1068_v42  ;;  %v138_v61 = vmul.f32 1.442695, %v108_v47 }
  0x43   :  { %713 = vmatmul.mubr.msk.f32.gmra.mrb[2].mxu0 %vm382_vm0, %v373_v3  ;;  %v844_v0 = vpop.eup %843  ;;  %v177_v1 = vsel %vm1074_vm7, %v174_v52, %v171_v55  ;;  %v305_v2 = vmul.f32 %v289_v59, %v168_v58  ;;  %v184_v3 = vand.u32 2147483647, %v1056_v26  ;;  %v208_v26 = vmul.f32 -0.5, %v1064_v36  ;;  %v83_v52 = vld [vmem:[#allocation6 + $0x30] sm:$0xff]  ;;  %v294_v55 = vld [vmem:[#allocation6 + $0x138] sm:$0xff] }
  0x44   :  { %v846_v5 = vpop.eup %845  ;;  %v306_v8 = vmul.f32 %v290_v60, %v177_v1  ;;  %v180_v9 = vmul.f32 0.6931472, %v844_v0  ;;  %859 = vlog2.f32 %v223_v63  ;;  %v218_v56 = vadd.f32 1.0, %v217_v46 }
  0x45   :  { %v1087_v12 = vpop.eup %847  ;;  %v321_v13 = vadd.f32 %v305_v2, %v79_v6  ;;  %vm185_vm8 = vcmp.lt.f32.partialorder %v184_v3, 0.0004427343  ;;  %v189_v14 = vmul.f32 0.6931472, %v846_v5  ;;  %v209_v44 = vadd.f32 1.0, %v208_v26 }
  0x46   :  { %v1093_v16 = vpop.eup %849  ;;  %v322_v17 = vadd.f32 %v306_v8, %v80_v7  ;;  %v186_v18 = vsel %vm185_vm8, %v183_v10, %v180_v9  ;;  %v226_v58 = vmul.f32 -0.5, %v1072_v54  ;;  %v219_v63 = vmul.f32 %v1068_v42, %v218_v56  ;;  %v295_v10 = vld [vmem:[#allocation6 + $0x140] sm:$0xff] }
  0x47   :  { %v852_v23 = vpop.eup %851  ;;  %v307_v24 = vmul.f32 %v291_v20, %v186_v18  ;;  %v195_v33 = vsel %vm1089_vm9, %v192_v19, %v189_v14  ;;  %v210_v53 = vmul.f32 %v1064_v36, %v209_v44  ;;  %v232_v2 = vadd.f32 1.0, %v1078_v57  ;;  %v297_v44 = vld [vmem:[#allocation6 + $0x150] sm:$0xff] }
  0x48   :  { %v854_v29 = vpop.eup %853  ;;  %v757_v30 = vpack.c.bf16 %v322_v17, %v321_v13  ;;  %v198_v28 = vmul.f32 0.6931472, %v852_v23  ;;  %v308_v38 = vmul.f32 %v292_v21, %v195_v33  ;;  %vm1123_vm12 = vcmp.lt.f32.partialorder %v220_v51, 0.0004427343  ;;  %v85_v23 = vld [vmem:[#allocation6 + $0x40] sm:$0xff] }
  0x49   :  { %v1102_v37 = vpop.eup %855  ;;  %v323_v39 = vadd.f32 %v307_v24, %v81_v31  ;;  %v207_v43 = vmul.f32 0.6931472, %v854_v29  ;;  %v227_v5 = vadd.f32 1.0, %v226_v58  ;;  %861 = vlog2.f32 %v232_v2  ;;  %v86_v29 = vld [vmem:[#allocation6 + $0x48] sm:$0xff]  ;;  %v298_v58 = vld [vmem:[#allocation6 + $0x158] sm:$0xff] }
  0x4a   :  { %758 = vmatprep.subr.bf16.mxu0 %v757_v30  ;;  %786 = vmatprep.subr.bf16.mxu1 %v757_v30  ;;  %v858_v48 = vpop.eup %857  ;;  %v324_v49 = vadd.f32 %v308_v38, %v82_v32  ;;  %v204_v34 = vsel %vm1104_vm10, %v201_v41, %v198_v28  ;;  %v229_v7 = vand.u32 2147483647, %v1072_v54  ;;  %v235_v8 = vmul.f32 -0.5, %v1078_v57 }
  0x4b   :  { %760 = vmatpush3.bf16.msra.mxu0 %v757_v30  ;;  %794 = vmatpush3.bf16.msra.mxu1 %v757_v30  ;;  %v309_v60 = vmul.f32 %v293_v45, %v204_v34  ;;  %v213_v0 = vsel %vm1110_vm11, %v210_v53, %v207_v43  ;;  %v216_v1 = vmul.f32 0.6931472, %v858_v48  ;;  %v241_v42 = vadd.f32 1.0, %v1087_v12 }
  0x4c   :  { %v761_v59 = vpack.c.bf16 %v324_v49, %v323_v39  ;;  %v310_v3 = vmul.f32 %v294_v55, %v213_v0  ;;  %863 = vpow2.f32 %v138_v61  ;;  %v228_v13 = vmul.f32 %v1072_v54, %v227_v5  ;;  %v296_v54 = vld [vmem:[#allocation6 + $0x148] sm:$0xff]  ;;  %v87_v55 = vld [vmem:[#allocation6 + $0x50] sm:$0xff]  ;;  %v88_v61 = vld [vmem:[#allocation6 + $0x58] sm:$0xff] }
  0x4d   :  { %v325_v36 = vadd.f32 %v309_v60, %v83_v52  ;;  %v222_v9 = vsel %vm1123_vm12, %v219_v63, %v216_v1  ;;  %865 = vlog2.f32 %v241_v42  ;;  %v244_v14 = vmul.f32 -0.5, %v1087_v12  ;;  %v300_v5 = vld [vmem:[#allocation6 + $0x168] sm:$0xff] }
  0x4e   :  { %762 = vmatprep.subr.bf16.mxu0 %v761_v59  ;;  %787 = vmatprep.subr.bf16.mxu1 %v761_v59  ;;  %v326_v6 = vadd.f32 %v310_v3, %v84_v62  ;;  %v250_v15 = vadd.f32 1.0, %v1093_v16  ;;  %v860_v17 = vpop.eup %859  ;;  %vm1135_vm13 = vcmp.lt.f32.partialorder %v229_v7, 0.0004427343  ;;  %v311_v19 = vmul.f32 %v295_v10, %v222_v9  ;;  %v90_v10 = vld [vmem:[#allocation6 + $0x68] sm:$0xff] }
  0x4f   :  { %764 = vmatpush3.bf16.msra.mxu0 %v761_v59  ;;  %795 = vmatpush3.bf16.msra.mxu1 %v761_v59  ;;  %v236_v20 = vadd.f32 1.0, %v235_v8  ;;  %v259_v21 = vadd.f32 1.0, %v1102_v37  ;;  %v225_v24 = vmul.f32 0.6931472, %v860_v17  ;;  %v238_v25 = vand.u32 2147483647, %v1078_v57 }
  0x50   :  { %v765_v11 = vpack.c.bf16 %v326_v6, %v325_v36  ;;  %867 = vlog2.f32 %v250_v15  ;;  %v247_v26 = vand.u32 2147483647, %v1087_v12  ;;  %v253_v27 = vmul.f32 -0.5, %v1093_v16  ;;  %v89_v8 = vld [vmem:[#allocation6 + $0x60] sm:$0xff] }
  0x51   :  { %869 = vlog2.f32 %v259_v21  ;;  %v231_v30 = vsel %vm1135_vm13, %v228_v13, %v225_v24  ;;  %v245_v31 = vadd.f32 1.0, %v244_v14  ;;  %v262_v32 = vmul.f32 -0.5, %v1102_v37  ;;  %v665_v24 = vld [vmem:[%s1198_s4 + $0x1] sm:$0x1] }
  0x52   :  { %766 = vmatprep.subr.bf16.mxu0 %v765_v11  ;;  %788 = vmatprep.subr.bf16.mxu1 %v765_v11  ;;  %v140_v33 = vmul.f32 1.442695, %v109_v22  ;;  %v312_v28 = vmul.f32 %v296_v54, %v231_v30  ;;  %v327_v35 = vadd.f32 %v311_v19, %v85_v23  ;;  %v237_v38 = vmul.f32 %v1078_v57, %v236_v20 }
  0x53   :  { %768 = vmatpush3.bf16.msra.mxu0 %v765_v11  ;;  %796 = vmatpush3.bf16.msra.mxu1 %v765_v11  ;;  %v862_v39 = vpop.eup %861  ;;  %vm1147_vm14 = vcmp.lt.f32.partialorder %v238_v25, 0.0004427343  ;;  %v254_v45 = vadd.f32 1.0, %v253_v27  ;;  %v246_v47 = vmul.f32 %v1087_v12, %v245_v31  ;;  %vm1152_vm15 = vcmp.lt.f32.partialorder %v247_v26, 0.0004427343  ;;  %v301_v31 = vld [vmem:[#allocation6 + $0x170] sm:$0xff] }
  0x54   :  { %871 = vpow2.f32 %v140_v33  ;;  %v328_v41 = vadd.f32 %v312_v28, %v86_v29  ;;  %v234_v43 = vmul.f32 0.6931472, %v862_v39  ;;  %v256_v49 = vand.u32 2147483647, %v1093_v16  ;;  %v302_v39 = vld [vmem:[#allocation6 + $0x178] sm:$0xff] }
  0x55   :  { %v263_v57 = vadd.f32 1.0, %v262_v32  ;;  %v265_v34 = vand.u32 2147483647, %v1102_v37  ;;  %v255_v12 = vmul.f32 %v1093_v16, %v254_v45  ;;  %v299_v16 = vld [vmem:[#allocation6 + $0x160] sm:$0xff]  ;;  %v354_v26 = vmul.f32 1.442695, %v665_v24 }
  0x56   :  { %v864_v46 = vpop.eup %863  ;;  %v769_v51 = vpack.c.bf16 %v328_v41, %v327_v35  ;;  %v240_v52 = vsel %vm1147_vm14, %v237_v38, %v234_v43  ;;  %vm1163_vm0 = vcmp.lt.f32.partialorder %v256_v49, 0.0004427343  ;;  %v91_v35 = vld [vmem:[#allocation6 + $0x70] sm:$0xff] }
  0x57   :  { %v866_v50 = vpop.eup %865  ;;  %v268_v53 = vadd.f32 1.0, %v864_v46  ;;  %v313_v59 = vmul.f32 %v297_v44, %v240_v52  ;;  %v264_v1 = vmul.f32 %v1102_v37, %v263_v57  ;;  %vm266_vm1 = vcmp.lt.f32.partialorder %v265_v34, 0.0004427343 }
  0x58   :  { %v243_v56 = vmul.f32 0.6931472, %v866_v50  ;;  %770 = vmatprep.subr.bf16.mxu0 %v769_v51  ;;  %789 = vmatprep.subr.bf16.mxu1 %v769_v51  ;;  %v271_v6 = vmul.f32 -0.5, %v864_v46  ;;  %v274_v20 = vand.u32 2147483647, %v864_v46 }
  0x59   :  { %873 = vlog2.f32 %v268_v53  ;;  %772 = vmatpush3.bf16.msra.mxu0 %v769_v51  ;;  %797 = vmatpush3.bf16.msra.mxu1 %v769_v51  ;;  %v329_v3 = vadd.f32 %v313_v59, %v87_v55  ;;  %v666_v53 = vld [vmem:[%s1198_s4 + $0x2] sm:$0x1]  ;;  %v351_v55 = vld [vmem:[%s1198_s4] sm:$0x1]  ;;  %s964_s4 = smov [#allocation9]  }
  0x5a   :  { %v868_v60 = vpop.eup %867  ;;  %v249_v62 = vsel %vm1152_vm15, %v246_v47, %v243_v56  ;;  %v272_v18 = vadd.f32 1.0, %v271_v6  ;;  %vm275_vm2 = vcmp.lt.f32.partialorder %v274_v20, 0.0004427343  ;;  %s649_s6 = sshll.u32 %s964_s4, 4  ;;  %s650_s6 = int_to_ptr.vmem [resolvable:$true] %s649_s6 }
  0x5b   :  { %v870_v63 = vpop.eup %869  ;;  %v314_v2 = vmul.f32 %v298_v58, %v249_v62  ;;  %v252_v36 = vmul.f32 0.6931472, %v868_v60  ;;  %s935_s7 = scalar_lea.vmem %s650_s6, 512  ;;  %p940_p9 = scmp.lt.s32.totalorder %s650_s6, %s650_s6 }
  0x5c   :  { %v261_v4 = vmul.f32 0.6931472, %v870_v63  ;;  %v273_v25 = vmul.f32 %v864_v46, %v272_v18  ;;  %p936_p8 = scmp.ne.s32.totalorder %s650_s6, %s935_s7  ;;  %p941_p10 = scmp.lt.s32.totalorder %s935_s7, %s935_s7 }
  0x5d   :  { %v330_v7 = vadd.f32 %v314_v2, %v88_v61  ;;  %v258_v42 = vsel %vm1163_vm0, %v255_v12, %v252_v36  ;;  %v667_v12 = vld [vmem:[#allocation3] ss:$0 sm:$0xff] }
  0x5e   :  { %v872_v9 = vpop.eup %871  ;;  %v267_v11 = vsel %vm266_vm1, %v264_v1, %v261_v4  ;;  %v315_v13 = vmul.f32 %v299_v16, %v258_v42  ;;  %p942_p11 = por %p941_p10, %p940_p9 }
  0x5f   :  { %v773_v14 = vpack.c.bf16 %v330_v7, %v329_v3  ;;  %v316_v37 = vmul.f32 %v300_v5, %v267_v11  ;;  %v277_v15 = vadd.f32 1.0, %v872_v9  ;;  %v280_v21 = vmul.f32 -0.5, %v872_v9 }
  0x60   :  { %v331_v17 = vadd.f32 %v315_v13, %v89_v8  ;;  %v283_v29 = vand.u32 2147483647, %v872_v9  ;;  %p943_p12 = pnand %p942_p11, %p936_p8 }
  0x61   :  { %774 = vmatprep.subr.bf16.mxu0 %v773_v14  ;;  %790 = vmatprep.subr.bf16.mxu1 %v773_v14  ;;  %v332_v19 = vadd.f32 %v316_v37, %v90_v10  ;;  %875 = vlog2.f32 %v277_v15  ;;  %v281_v27 = vadd.f32 1.0, %v280_v21 }
  0x62   :  { %776 = vmatpush3.bf16.msra.mxu0 %v773_v14  ;;  %798 = vmatpush3.bf16.msra.mxu1 %v773_v14  ;;  %877 = vpow2.f32 %v354_v26  ;;  %vm284_vm3 = vcmp.lt.f32.partialorder %v283_v29, 0.0004427343 }
  0x63   :  { %v874_v22 = vpop.eup %873  ;;  %v777_v23 = vpack.c.bf16 %v332_v19, %v331_v17  ;;  %v282_v32 = vmul.f32 %v872_v9, %v281_v27 }
  0x64   :  { %v270_v54 = vmul.f32 0.6931472, %v874_v22 }
  0x65   :  { %778 = vmatprep.subr.bf16.mxu0 %v777_v23  ;;  %791 = vmatprep.subr.bf16.mxu1 %v777_v23 }
  0x66   :  { %780 = vmatpush3.bf16.msra.mxu0 %v777_v23  ;;  %799 = vmatpush3.bf16.msra.mxu1 %v777_v23  ;;  %v276_v30 = vsel %vm275_vm2, %v273_v25, %v270_v54 }
  0x67   :  { %v317_v28 = vmul.f32 %v301_v31, %v276_v30 }
  0x69   :  { %v333_v44 = vadd.f32 %v317_v28, %v91_v35 }
  0x6b   :  { %v876_v33 = vpop.eup %875 }
  0x6c   :  { %v279_v38 = vmul.f32 0.6931472, %v876_v33  ;;  %v878_v45 = vpop.eup %877 }
  0x6d   :  { %v356_v47 = vadd.f32 1.0, %v878_v45  ;;  %v359_v49 = vmul.f32 -0.5, %v878_v45  ;;  %v362_v50 = vand.u32 2147483647, %v878_v45 }
  0x6e   :  { %v285_v41 = vsel %vm284_vm3, %v282_v32, %v279_v38 }
  0x6f   :  { %v318_v43 = vmul.f32 %v302_v39, %v285_v41  ;;  %879 = vlog2.f32 %v356_v47  ;;  %v360_v57 = vadd.f32 1.0, %v359_v49  ;;  %vm363_vm4 = vcmp.lt.f32.partialorder %v362_v50, 0.0004427343 }
  0x71   :  { %v334_v46 = vadd.f32 %v318_v43, %v92_v40  ;;  %v361_v51 = vmul.f32 %v878_v45, %v360_v57 }
  0x73   :  { %v781_v48 = vpack.c.bf16 %v334_v46, %v333_v44 }
  0x75   :  { %782 = vmatprep.subr.bf16.mxu0 %v781_v48  ;;  %792 = vmatprep.subr.bf16.mxu1 %v781_v48 }
  0x76   :  { %784 = vmatpush3.bf16.msra.mxu0 %v781_v48  ;;  %800 = vmatpush3.bf16.msra.mxu1 %v781_v48 }
  0x79   :  { %v880_v52 = vpop.eup %879 }
  0x7a   :  { %v358_v34 = vmul.f32 0.6931472, %v880_v52 }
  0x7c   :  { %v364_v56 = vsel %vm363_vm4, %v361_v51, %v358_v34 }
  0x7d   :  { %v367_v58 = vmul.f32 %v666_v53, %v364_v56 }
  0x7f   :  { %v368_v59 = vadd.f32 %v367_v58, %v351_v55 }
  0x81   :  { %369 = vst [vmem:[#allocation5] sm:$0x1] %v368_v59 }
  0x88   :  { %v677_v18 = vld [vmem:[#allocation5] ss:$0 sm:$0xff] }
 0x112   :  { %v711_v60 = vpop.f32.mrb[0].mxu0 }
 0x113   :  { %v471_v61 = vadd.f32 %v711_v60, %v667_v12  ;;  %v465_v62 = vpop.f32.mrb[1].mxu0 }
 0x114   :  { %v466_v0 = vadd.f32 %v667_v12, %v465_v62 }
 0x115   :  { %v674_v1 = vmul.f32 -1.442695, %v471_v61 }
 0x116   :  { %v673_v63 = vmul.f32 -1.442695, %v466_v0  ;;  %v714_v2 = vpop.f32.mrb[2].mxu0 }
 0x117   :  { %881 = vpow2.f32 %v674_v1  ;;  %v481_v3 = vadd.f32 %v714_v2, %v667_v12  ;;  %v475_v36 = vpop.f32.mrb[3].mxu0 }
 0x118   :  { %883 = vpow2.f32 %v673_v63  ;;  %v476_v16 = vadd.f32 %v667_v12, %v475_v36 }
 0x119   :  { %v676_v4 = vmul.f32 -1.442695, %v481_v3 }
 0x11a   :  { %v675_v5 = vmul.f32 -1.442695, %v476_v16 }
 0x11b   :  { %885 = vpow2.f32 %v676_v4 }
 0x11c   :  { %887 = vpow2.f32 %v675_v5 }
 0x121   :  { %v882_v6 = vpop.eup %881 }
 0x122   :  { %v884_v7 = vpop.eup %883  ;;  %v497_v8 = vadd.f32 1.0, %v882_v6 }
 0x123   :  { %v496_v42 = vadd.f32 1.0, %v884_v7 }
 0x125   :  { %v886_v9 = vpop.eup %885  ;;  %889 = vrcp.f32 %v496_v42 }
 0x126   :  { %v888_v10 = vpop.eup %887  ;;  %891 = vrcp.f32 %v497_v8  ;;  %v499_v11 = vadd.f32 1.0, %v886_v9 }
 0x127   :  { %v498_v13 = vadd.f32 1.0, %v888_v10 }
 0x129   :  { %893 = vrcp.f32 %v498_v13 }
 0x12a   :  { %895 = vrcp.f32 %v499_v11 }
 0x12f   :  { %v890_v14 = vpop.eup %889 }
 0x130   :  { %v892_v37 = vpop.eup %891  ;;  %747 = vmatprep.mubr.f32.mxu0 %v890_v14 }
 0x131   :  { %748 = vmatmul.mubr.f32.vlgmr.msra.gmra.mrb[4].mxu0 %v892_v37 }
 0x133   :  { %v894_v15 = vpop.eup %893 }
 0x134   :  { %v896_v17 = vpop.eup %895  ;;  %750 = vmatprep.mubr.f32.mxu1 %v894_v15 }
 0x135   :  { %751 = vmatmul.mubr.f32.vlgmr.msra.gmra.mrb[0].mxu1 %v896_v17 }
 0x204   :  { %v749_v19 = vpop.f32.mrb[4].mxu0 }
 0x205   :  { %v603_v20 = vadd.f32 %v749_v19, %v677_v18  ;;  %v597_v21 = vpop.f32.mrb[5].mxu0 }
 0x206   :  { %v598_v22 = vadd.f32 %v677_v18, %v597_v21 }
 0x207   :  { %v679_v23 = vmul.f32 -1.442695, %v603_v20 }
 0x208   :  { %v678_v24 = vmul.f32 -1.442695, %v598_v22  ;;  %v752_v54 = vpop.f32.mrb[0].mxu1 }
 0x209   :  { %897 = vpow2.f32 %v679_v23  ;;  %v613_v25 = vadd.f32 %v752_v54, %v677_v18  ;;  %v607_v26 = vpop.f32.mrb[1].mxu1 }
 0x20a   :  { %899 = vpow2.f32 %v678_v24  ;;  %v608_v27 = vadd.f32 %v677_v18, %v607_v26 }
 0x20b   :  { %v681_v29 = vmul.f32 -1.442695, %v613_v25 }
 0x20c   :  { %v680_v30 = vmul.f32 -1.442695, %v608_v27 }
 0x20d   :  { %901 = vpow2.f32 %v681_v29 }
 0x20e   :  { %903 = vpow2.f32 %v680_v30 }
 0x213   :  { %v898_v31 = vpop.eup %897 }
 0x214   :  { %v900_v32 = vpop.eup %899  ;;  %v629_v33 = vadd.f32 1.0, %v898_v31 }
 0x215   :  { %v628_v28 = vadd.f32 1.0, %v900_v32 }
 0x216   :  { %905 = vrcp.f32 %v629_v33 }
 0x217   :  { %v902_v35 = vpop.eup %901  ;;  %907 = vrcp.f32 %v628_v28 }
 0x218   :  { %v904_v38 = vpop.eup %903  ;;  %v631_v39 = vadd.f32 1.0, %v902_v35 }
 0x219   :  { %v630_v40 = vadd.f32 1.0, %v904_v38 }
 0x21a   :  { %909 = vrcp.f32 %v631_v39 }
 0x21b   :  { %911 = vrcp.f32 %v630_v40 }
 0x220   :  { %v906_v41 = vpop.eup %905 }
 0x221   :  { %v908_v43 = vpop.eup %907  ;;  %641 = vst [vmem:[#allocation9 + $0x8] sm:$0xff] %v906_v41 }
 0x222   :  { %640 = vst [vmem:[#allocation9] sm:$0xff] %v908_v43 }
 0x224   :  { %v910_v44 = vpop.eup %909 }
 0x225   :  { %v912_v45 = vpop.eup %911  ;;  %643 = vst [vmem:[#allocation9 + $0x18] sm:$0xff] %v910_v44 }
 0x226   :  { %642 = vst [vmem:[#allocation9 + $0x10] sm:$0xff] %v912_v45 }
 0x227   :  { %946 = shalt.err (!%p943_p12)
}
 0x228   :  { %s947_s10 = scalar_lea.hbm %s1199_s5, 512 }
 0x229   :  { %p948_p13 = scmp.ne.s32.totalorder %s1199_s5, %s947_s10  ;;  %p951_p0 = scmp.lt.u32.totalorder %s947_s10, %s1199_s5 }
 0x22b   :  { %p953_p1 = pnand %p951_p0, %p948_p13 }
 0x22d   :  { %956 = shalt.err (!%p953_p1)
}
 0x22e   :  { %655 = dma.vmem_to_hbm [thread:$0]  %s650_s6, 512, %s1199_s5, [#allocation8], %s962_s28, %s962_s28, %s963_s29  }
 0x22f   :  { %959 = dma.done.wait [#allocation8], 512  }
 0x230   :  { %960 = vsyncadd [#allocation8], 4294966784 }
 0x231   :  { %659 = vsyncpa [#allocation7], 1 }
 0x232   :  { %660 = vsyncpa [#allocation8], 1 }

</bundles_post_ra>
